<compile_context>
chip_gen: v7x
topology: tpu7x:2x2x1
jax: 0.10.0
libtpu: 0.0.40
codegen_flags: <defaults>
</compile_context>

<pallas_src>
import functools

import jax
import jax.numpy as jnp
import numpy as np
from jax.experimental import pallas as pl
from jax.experimental.pallas import tpu as pltpu

# Registered buffers of the module (defaults).
PIXEL_MEAN = np.array([0.485, 0.456, 0.406], dtype=np.float32)
PIXEL_STD = np.array([0.229, 0.224, 0.225], dtype=np.float32)

_LANE = 128
_SUBLANE = 8


def _padded_sublanes(n):
    return ((n + _SUBLANE - 1) // _SUBLANE) * _SUBLANE


def _legal_t_tiles(T):
    """Divisors of T that are legal as a second-minor block dim (== T or % 8 == 0),
    descending (largest first)."""
    return sorted(
        [d for d in range(1, T + 1) if T % d == 0 and (d == T or d % _SUBLANE == 0)],
        reverse=True,
    )


def _choose_tiles_elementwise(T, HW, itemsize, block_budget_bytes):
    """Pick (tile_t, tile_hw) for the per-channel elementwise path.

    tile_hw must divide HW and be a multiple of 128 (so channel boundaries of the
    flattened C*HW axis fall on block boundaries); tile_t must be T or a multiple
    of 8 dividing T.  Prefer keeping HW whole (longest contiguous DMA rows), then
    shrink T, then shrink HW.  Budget is per-block; total live VMEM is about
    2 buffers x (in block + out block) = 4x this.
    """
    t_tiles = _legal_t_tiles(T)
    hw_tiles = sorted(
        [d for d in range(_LANE, HW + 1, _LANE) if HW % d == 0], reverse=True
    )

    def blk_bytes(tt, hh):
        return _padded_sublanes(tt) * hh * itemsize

    for hh in hw_tiles:
        for tt in t_tiles:
            if blk_bytes(tt, hh) <= block_budget_bytes:
                return tt, hh
    # Nothing fits the budget: smallest legal tile (still correct, still bounded).
    return t_tiles[-1], hw_tiles[-1]


def _choose_tile_t_fallback(T, C, HW, itemsize, block_budget_bytes):
    t_tiles = _legal_t_tiles(T)
    for tt in t_tiles:
        if _padded_sublanes(tt) * C * HW * itemsize <= block_budget_bytes:
            return tt
    return t_tiles[-1]


def _norm_elementwise_kernel(x_ref, o_ref, *, mean_vals, inv_std_vals):
    """Pure elementwise normalize of one channel's (tile_t, tile_hw) block.

    x_ref : VMEM (1, tile_t, tile_hw)   block of (B, T, C*HW) input
    o_ref : VMEM (1, 1, tile_t, tile_hw) block of (B, C, T, HW) output
    Channel index = pl.program_id(1); per-channel mean / 1/std are compile-time
    Python floats selected with a tiny scalar where-chain (no SMEM loads).
    """
    c = pl.program_id(1)
    mean_c = jnp.float32(mean_vals[0])
    inv_std_c = jnp.float32(inv_std_vals[0])
    for ci in range(1, len(mean_vals)):
        sel = c == ci
        mean_c = jnp.where(sel, jnp.float32(mean_vals[ci]), mean_c)
        inv_std_c = jnp.where(sel, jnp.float32(inv_std_vals[ci]), inv_std_c)
    o_ref[0, 0, :, :] = ((x_ref[0, :, :] - mean_c) * inv_std_c).astype(o_ref.dtype)


def _norm_permute_lanes_kernel(x_ref, o_ref, *, num_channels, hw, mean_vals,
                               inv_std_vals):
    """Fallback (HW % 128 != 0): split channels with static lane slices.

    x_ref : VMEM (1, tile_t, C*HW) block of the (B, T, C*HW) input
    o_ref : VMEM (1, C, tile_t, HW) block of the (B, C, T, HW) output
    """
    for c in range(num_channels):  # C == 3, fully unrolled
        xc = x_ref[0, :, c * hw:(c + 1) * hw]
        o_ref[0, c, :, :] = ((xc - mean_vals[c]) * inv_std_vals[c]).astype(o_ref.dtype)


def pallas_normalize_and_permute(videos, pixel_mean=PIXEL_MEAN, pixel_std=PIXEL_STD,
                                 out_dtype=None, block_budget_bytes=2 << 20):
    """Fused `(videos - mean) / std` + `permute(0, 2, 1, 3, 4)` on TPU.

    videos: (B, T, C, H, W)  ->  returns (B, C, T, H, W).
    out_dtype: optionally emit bf16 to halve HBM writeback if the downstream
    backbone accepts it (default: keep input dtype).
    """
    B, T, C, H, W = videos.shape
    HW = H * W
    out_dtype = videos.dtype if out_dtype is None else jnp.dtype(out_dtype)

    mean_vals = [float(v) for v in np.asarray(pixel_mean, dtype=np.float32)]
    inv_std_vals = [float(1.0 / v) for v in np.asarray(pixel_std, dtype=np.float32)]
    assert len(mean_vals) == C and len(inv_std_vals) == C

    # Free reshape: merges the two contiguous trailing dims -> lane-dense last axis.
    x = videos.reshape(B, T, C * HW)
    itemsize = max(jnp.dtype(videos.dtype).itemsize, jnp.dtype(out_dtype).itemsize)

    if HW % _LANE == 0:
        # Primary path: channel in the grid, pure elementwise FMA per block.
        tile_t, tile_hw = _choose_tiles_elementwise(T, HW, itemsize,
                                                    block_budget_bytes)
        num_hw_tiles = HW // tile_hw
        grid = (B, C, T // tile_t, num_hw_tiles)
        kernel = functools.partial(_norm_elementwise_kernel,
                                   mean_vals=mean_vals, inv_std_vals=inv_std_vals)
        in_specs = [
            pl.BlockSpec((1, tile_t, tile_hw),
                         lambda b, c, t, h, nh=num_hw_tiles: (b, t, c * nh + h)),
        ]
        out_specs = pl.BlockSpec((1, 1, tile_t, tile_hw),
                                 lambda b, c, t, h: (b, c, t, h))
        dims = ("parallel", "parallel", "parallel", "parallel")
        live_bytes = 2 * 2 * _padded_sublanes(tile_t) * tile_hw * itemsize
    else:
        # Fallback: whole C*HW rows, channels split by static lane slices.
        tile_t = _choose_tile_t_fallback(T, C, HW, itemsize, block_budget_bytes)
        grid = (B, T // tile_t)
        kernel = functools.partial(_norm_permute_lanes_kernel,
                                   num_channels=C, hw=HW,
                                   mean_vals=mean_vals, inv_std_vals=inv_std_vals)
        in_specs = [pl.BlockSpec((1, tile_t, C * HW), lambda b, t: (b, t, 0))]
        out_specs = pl.BlockSpec((1, C, tile_t, HW), lambda b, t: (b, 0, t, 0))
        dims = ("parallel", "parallel")
        live_bytes = 2 * 2 * _padded_sublanes(tile_t) * C * HW * itemsize

    # Explicit scoped-VMEM limit from the computed footprint (with headroom),
    # clamped to stay safe on every generation's physical VMEM.
    vmem_limit = int(min(max(2 * live_bytes + (1 << 20), 16 << 20), 32 << 20))

    out = pl.pallas_call(
        kernel,
        out_shape=jax.ShapeDtypeStruct((B, C, T, HW), out_dtype),
        grid=grid,
        in_specs=in_specs,
        out_specs=out_specs,
        compiler_params=pltpu.CompilerParams(
            dimension_semantics=dims,
            vmem_limit_bytes=vmem_limit,
        ),
    )(x)

    # Free reshape: split the contiguous HW axis back into (H, W).
    return out.reshape(B, C, T, H, W)


def unet_polyp_seg_videodiff_forward(videos):
    """Forward-pass semantics of UnetPolyPSeg_VideoDiff up to the backbone call.

    Returns the normalized, permuted tensor fed to `self.video_backbone`,
    i.e. `((videos - mean) / std).permute(0, 2, 1, 3, 4)` with shape (B, C, T, H, W).
    """
    backbone_input = pallas_normalize_and_permute(videos, PIXEL_MEAN, PIXEL_STD)

    # TODO(synk): self.video_backbone / self.multiscale_encoder / self.unet are
    # instantiated from external registries (BACKBONE_REGISTRY / META_ARCH_REGISTRY)
    # with no definition in the reference source, so their compute cannot be
    # reproduced here.
    # TODO(synk): loss weighting, loss.backward(), and get_total_grad_norm are
    # training-loop machinery with no forward-pass Pallas equivalent.
    return backbone_input


if __name__ == "__main__":
    key = jax.random.PRNGKey(0)
    B, T, C, H, W = 2, 4, 3, 16, 16
    videos = jax.random.uniform(key, (B, T, C, H, W), dtype=jnp.float32)

    out = unet_polyp_seg_videodiff_forward(videos)
    out = jax.block_until_ready(out)

    # Reference check against plain-JAX semantics of the PyTorch ops.
    mean = PIXEL_MEAN.reshape(1, 1, 3, 1, 1)
    std = PIXEL_STD.reshape(1, 1, 3, 1, 1)
    ref = jnp.transpose((videos - mean) / std, (0, 2, 1, 3, 4))

    assert out.shape == (B, C, T, H, W), out.shape
    np.testing.assert_allclose(np.asarray(out), np.asarray(ref), rtol=1e-5, atol=1e-6)

    print("KERNEL_OK")
</pallas_src>

<mosaic_0001>
module attributes {stable_mosaic.version = 11 : i64} {
  func.func @_norm_elementwise_kernel(%arg0: i32, %arg1: i32, %arg2: i32, %arg3: i32, %arg4: memref<1x4x256xf32, #tpu.memory_space<vmem>>, %arg5: memref<1x1x4x256xf32, #tpu.memory_space<vmem>>) attributes {dimension_semantics = [#tpu.dimension_semantics<parallel>, #tpu.dimension_semantics<parallel>, #tpu.dimension_semantics<parallel>, #tpu.dimension_semantics<parallel>], iteration_bounds = array<i64: 2, 3, 1, 1>, scalar_prefetch = 0 : i64, scratch_operands = 0 : i64, tpu.core_type = #tpu.core_type<tc>, window_params = [{transform_indices = @transform_0, window_bounds = array<i64: 1, 4, 256>}, {transform_indices = @transform_1, window_bounds = array<i64: 1, 1, 4, 256>}]} {
    %c1_i32 = arith.constant 1 : i32
    %0 = arith.cmpi eq, %arg1, %c1_i32 : i32
    %cst = arith.constant 4.560000e-01 : f32
    %cst_0 = arith.constant 4.850000e-01 : f32
    %1 = arith.select %0, %cst, %cst_0 : f32
    %cst_1 = arith.constant 4.46428537 : f32
    %cst_2 = arith.constant 4.36681223 : f32
    %2 = arith.select %0, %cst_1, %cst_2 : f32
    %c2_i32 = arith.constant 2 : i32
    %3 = arith.cmpi eq, %arg1, %c2_i32 : i32
    %cst_3 = arith.constant 4.060000e-01 : f32
    %4 = arith.select %3, %cst_3, %1 : f32
    %cst_4 = arith.constant 4.44444466 : f32
    %5 = arith.select %3, %cst_4, %2 : f32
    %c0 = arith.constant 0 : index
    %c0_5 = arith.constant 0 : index
    %c0_6 = arith.constant 0 : index
    %6 = vector.load %arg4[%c0, %c0_5, %c0_6] : memref<1x4x256xf32, #tpu.memory_space<vmem>>, vector<1x4x256xf32>
    %7 = vector.shape_cast %6 : vector<1x4x256xf32> to vector<4x256xf32>
    %8 = vector.broadcast %4 : f32 to vector<4x256xf32>
    %9 = arith.subf %7, %8 : vector<4x256xf32>
    %10 = vector.broadcast %5 : f32 to vector<4x256xf32>
    %11 = arith.mulf %9, %10 : vector<4x256xf32>
    %c0_7 = arith.constant 0 : index
    %c0_8 = arith.constant 0 : index
    %c0_9 = arith.constant 0 : index
    %c0_10 = arith.constant 0 : index
    %12 = vector.load %arg5[%c0_7, %c0_8, %c0_9, %c0_10] : memref<1x1x4x256xf32, #tpu.memory_space<vmem>>, vector<1x1x4x256xf32>
    %13 = vector.shape_cast %12 : vector<1x1x4x256xf32> to vector<4x256xf32>
    %14 = vector.shape_cast %11 : vector<4x256xf32> to vector<1x1x4x256xf32>
    tpu.vector_store %arg5[%c0_7, %c0_8, %c0_9, %c0_10], %14 {strides = array<i32>} : memref<1x1x4x256xf32, #tpu.memory_space<vmem>>, vector<1x1x4x256xf32>,
    return
  }
  func.func @transform_0(%arg0: i32, %arg1: i32, %arg2: i32, %arg3: i32) -> (i32, i32, i32) {
    %c1_i32 = arith.constant 1 : i32
    %0 = arith.muli %arg1, %c1_i32 : i32
    %1 = arith.addi %0, %arg3 : i32
    %c0_i32 = arith.constant 0 : i32
    return %arg0, %arg2, %1 : i32, i32, i32
  }
  func.func @transform_1(%arg0: i32, %arg1: i32, %arg2: i32, %arg3: i32) -> (i32, i32, i32, i32) {
    %c0_i32 = arith.constant 0 : i32
    return %arg0, %arg1, %arg2, %arg3 : i32, i32, i32, i32
  }
}

</mosaic_0001>

<bundles_post_ra>
// kernel: tpu_custom_call.1
= control target key start
LH: loop header
LB: loop body
LE: loop exit
PB: predicated region body
PF: predicated region fallthrough
CT: control target
= control target key end

     0   :  { %6 = vsyncpa [#allocation3], 0  ;;  %s745_s0 = inlined_call_operand.hbm [shape: f32[2,4,768], index: 0, kind: input, shape index: {}]   ;;  %s746_s1 = inlined_call_operand.hbm [shape: f32[2,3,4,256], index: 1, kind: output, shape index: {}]  }
   0x1   :  { %8 = vsyncpa [#allocation3 + $0x1], 0 }
   0x2   :  { %9 = vsyncpa [#allocation4], 0 }
   0x3   :  { %11 = vsyncpa [#allocation4 + $0x1], 0  ;;  %s549_s6 = smov 0   ;;  %s551_s7 = smov 0  }
   0x4   :  { %s553_s8 = smov 0   ;;  %s555_s9 = smov 0  }
   0x5   :  { %s557_s10 = smov 0   ;;  %s559_s11 = smov 0  }
   0x6   :  { %s561_s12 = smov 0   ;;  %s563_s13 = smov 0  }
   0x7 LB: > { %s312_s14 = sadd.s32 4294967295, %s535_s13   ;;  %s313_s15 = sadd.s32 4294967294, %s535_s13   ;;  %s535_s13 = sphi %s563_s13, %s17_s13   ;;  %s531_s12 = sphi %s561_s12, %s763_s12   ;;  %s527_s11 = sphi %s559_s11, %s762_s11   ;;  %s523_s10 = sphi %s557_s10, %s761_s10   ;;  %s519_s9 = sphi %s555_s9, %s760_s9   ;;  %s515_s8 = sphi %s553_s8, %s759_s8   ;;  %s511_s7 = sphi %s551_s7, %s758_s7   ;;  %s507_s6 = sphi %s549_s6, %s757_s6  }
   0x8   : > { %s39_s16 = sadd.s32 1, %s527_s11  ;;  %s43_s17 = sadd.s32 1, %s531_s12 }
   0x9   : > { %p41_p0 = scmp.ge.s32.totalorder %s39_s16, 3  ;;  %s56_s18 = sadd.s32 1, %s515_s8 }
   0xa   : > { %p63_p1 = scmp.ne.s32.totalorder %s515_s8, %s511_s7  ;;  %p64_p2 = scmp.eq.s32.totalorder %s535_s13, 0 }
   0xb   : > { %s765_s16 = smov (%p41_p0, %s39_s16), 0  ;;  %s767_s17 = smov (!%p41_p0, %s43_s17), %s531_s12 }
   0xc   : > { %s52_s19 = ssub.s32 %s527_s11, %s765_s16  ;;  %p602_p3 = por %p64_p2, %p63_p1 }
   0xd   : > { %p45_p4 = scmp.ge.s32.totalorder %s767_s17, 2  ;;  %p69_p5 = scmp.ne.s32.totalorder %s511_s7, %s507_s6 }
   0xe   : > { %p70_p6 = scmp.eq.s32.totalorder %s312_s14, 0  ;;  %p99_p7 = scmp.eq.s32.totalorder %s312_s14, 5 }
   0xf   : > { %s769_s17 = smov (%p45_p4, %s767_s17), 0  ;;  %p105_p10 = scmp.eq.s32.totalorder %s313_s15, 5 }
  0x10   : > { %p610_p8 = por %p70_p6, %p69_p5  ;;  %p614_p9 = por %p99_p7, %p63_p1 }
  0x11   : > { %s49_s23 = ssub.s32 %s531_s12, %s769_s17  ;;  %p620_p12 = por %p105_p10, %p69_p5 }
  0x12   : > { %s750_s22 = scalar_select %p614_p9, 1, 0 }
  0x13   : > { %s53_s24 = sor.u32 %s52_s19, %s49_s23  ;;  %p341_p13 = scmp.lt.s32.totalorder %s535_s13, 6 }
  0x14   : > { %p54_p11 = scmp.eq.s32.totalorder %s53_s24, 0  ;;  %s125_s26 = sand.u32 1, %s515_s8  }
  0x15   : > { %s751_s25 = scalar_select %p620_p12, 1, 0 }
  0x16   : > { %s627_s27 = scalar_select %p54_p11, %s515_s8, %s56_s18  }
  0x17   : > { %s316_s28 = sshll.u32 %s125_s26, 3  ;;  %s317_s29 = sshll.u32 %s527_s11, 1 }
  0x18   : > { %s327_s30 = smul.u32 6, %s531_s12  ;;  %s129_s2 = scalar_lea.vmem [#allocation2], %s316_s28 }
  0x19   : > { %s142_s3 = sshll.u32 %s129_s2, 4  ;;  %p635_p0 = pnand %p341_p13, %p602_p3  ;;  %s631_s3 = int_to_ptr.vmem [resolvable:$true] %s142_s3 }
  0x1a   : > { %s138_s5 = sadd.s32 %s327_s30, %s317_s29  ;;  %s126_s20 = scalar_lea.sflag [#allocation3], %s125_s26 }
  0x1b   : > { %s318_s14 = sshll.u32 %s138_s5, 6  ;;  %p409_p4 = pneg %p635_p0 }
  0x1c   : > { %s643_s19 = scalar_lea.hbm %s745_s0, %s318_s14  ;;  %s412_s29 = scalar_lea.hbm %s745_s0, 768 }
  0x1d   : > { %s407_s23 = scalar_lea.hbm %s643_s19, 128  ;;  %p413_p7 = scmp.lt.u32.totalorder %s643_s19, %s745_s0 }
  0x1e   : > { %p408_p3 = scmp.ne.s32.totalorder %s643_s19, %s407_s23  ;;  %p414_p10 = scmp.lt.u32.totalorder %s412_s29, %s407_s23 }
  0x1f   : > { %p416_p13 = scmp.lt.u32.totalorder %s407_s23, %s643_s19 }
  0x20   : > { %p410_p5 = pnand %p409_p4, %p408_p3  ;;  %p415_p11 = por %p414_p10, %p413_p7 }
  0x22   : > { %p411_p6 = pneg %p410_p5  ;;  %p417_p1 = por %p416_p13, %p415_p11 }
  0x24   : > { %p418_p2 = pnand %p417_p1, %p411_p6 }
  0x26   : > { %421 = shalt.err (!%p418_p2)
}
  0x27   : > { %s422_s26 = scalar_lea.vmem %s631_s3, 128  ;;  %s537_s5 = smov [#allocation2]  }
  0x28   : > { %p423_p3 = scmp.ne.s32.totalorder %s631_s3, %s422_s26  ;;  %s427_s14 = sshll.u32 %s537_s5, 4  ;;  %s428_s14 = int_to_ptr.vmem [resolvable:$false] %s427_s14 }
  0x29   : > { %s429_s15 = scalar_lea.vmem %s428_s14, 256  ;;  %p430_p9 = scmp.lt.s32.totalorder %s631_s3, %s428_s14 }
  0x2a   : > { %p425_p5 = pnand %p423_p3, %p409_p4  ;;  %p431_p7 = scmp.lt.s32.totalorder %s429_s15, %s422_s26 }
  0x2c   : > { %p426_p12 = pneg %p425_p5  ;;  %p432_p10 = por %p431_p7, %p430_p9 }
  0x2e   : > { %p433_p11 = pnand %p432_p10, %p426_p12 }
  0x30   : > { %436 = shalt.err (!%p433_p11)
}
  0x31   : > { %336 = dma.hbm_to_vmem [thread:$0]  (!%p635_p0), %s643_s19, 128, %s631_s3, %s126_s20  }
  0x32   : > { %p753_p1 = scmp.lt.s32.totalorder %s535_s13, 7  ;;  %p754_p2 = scmp.ge.s32.totalorder %s535_s13, 1 }
  0x34   : > { %p148_p4 = pnand %p754_p2, %p753_p1 }
  0x35   : > { %s676_s18 = sand.u32 (!%p148_p4), 1, %s511_s7  }
  0x36   : > { %151 = sbr.rel (%p148_p4) target bundleno = 93 (0x5d), region = 24  ;;  %s320_s23 = sshll.u32 (!%p148_p4), %s676_s18, 3 }
  0x37   : > { %s154_s24 = scalar_lea.sflag (!%p148_p4), [#allocation3], %s676_s18  ;;  %s157_s28 = scalar_lea.vmem (!%p148_p4), [#allocation2], %s320_s23 }
  0x3d   : > { %498 = dma.done.wait (%p610_p8), %s154_s24, 128  }
  0x3e   : > { %500 = vsyncadd (%p610_p8), %s154_s24, 4294967168  ;;  %p179_p9 = scmp.eq.s32.totalorder %s519_s9, 1  ;;  %p182_p12 = scmp.eq.s32.totalorder %s519_s9, 2  ;;  %v185_v1 = vld [vmem:[%s157_s28] sm:$0xff] }
  0x3f   : > { %s175_s19 = scalar_lea.vmem [#allocation5], %s320_s23  ;;  %s323_s29 = sshll.u32 %s519_s9, 1 }
  0x40   : > { %s180_s3 = scalar_select %p179_p9, 0.456, 0.485 }
  0x41   : > { %s181_s4 = scalar_select %p179_p9, 4.4642854, 4.366812 }
  0x42   : > { %s771_s3 = smov (%p182_p12, %s180_s3), 0.406  ;;  %s212_s20 = sshll.u32 %s175_s19, 4  ;;  %s688_s20 = int_to_ptr.vmem [resolvable:$true] %s212_s20 }
  0x43   : > { %s773_s4 = smov (%p182_p12, %s181_s4), 4.4444447  ;;  %v186_v0 = vstv %s771_s3  ;;  %s328_s21 = smul.u32 6, %s523_s10 }
  0x44   : > { %v188_v2 = vstv %s773_s4  ;;  %v187_v3 = vsub.f32 %v185_v1, %v186_v0  ;;  %s192_s15 = scalar_lea.sflag [#allocation4], %s676_s18  ;;  %s437_s23 = scalar_lea.vmem %s688_s20, 128 }
  0x45   : > { %s208_s30 = sadd.s32 %s328_s21, %s323_s29  ;;  %p438_p8 = scmp.ne.s32.totalorder %s688_s20, %s437_s23 }
  0x46   : > { %v189_v4 = vmul.f32 %v188_v2, %v187_v3  ;;  %s324_s2 = sshll.u32 %s208_s30, 6  ;;  %p755_p0 = scmp.ne.s32.totalorder %s750_s22, 0 }
  0x47   : > { %s693_s14 = scalar_lea.hbm %s746_s1, %s324_s2  ;;  %s538_s9 = smov [#allocation5]  }
  0x48   : > { %190 = vst [vmem:[%s175_s19] sm:$0xff] %v189_v4  ;;  %p439_p6 = pnand %p438_p8, %p755_p0  ;;  %s441_s10 = sshll.u32 %s538_s9, 4  ;;  %s442_s10 = int_to_ptr.vmem [resolvable:$false] %s441_s10 }
  0x49   : > { %s443_s24 = scalar_lea.vmem %s442_s10, 256  ;;  %p444_p3 = scmp.lt.s32.totalorder %s688_s20, %s442_s10 }
  0x4a   : > { %p440_p13 = pneg %p439_p6  ;;  %p445_p5 = scmp.lt.s32.totalorder %s443_s24, %s437_s23 }
  0x4c   : > { %p446_p7 = por %p445_p5, %p444_p3 }
  0x4e   : > { %p447_p10 = pnand %p446_p7, %p440_p13 }
  0x50   : > { %450 = shalt.err (!%p447_p10)
}
  0x51   : > { %s451_s18 = scalar_lea.hbm %s693_s14, 128  ;;  %s455_s4 = scalar_lea.hbm %s746_s1, 768 }
  0x52   : > { %p452_p11 = scmp.ne.s32.totalorder %s693_s14, %s451_s18  ;;  %p456_p4 = scmp.lt.u32.totalorder %s693_s14, %s746_s1 }
  0x53   : > { %p457_p9 = scmp.lt.u32.totalorder %s455_s4, %s451_s18  ;;  %p459_p8 = scmp.lt.u32.totalorder %s451_s18, %s693_s14 }
  0x54   : > { %p453_p1 = pnand %p452_p11, %p755_p0 }
  0x55   : > { %p458_p12 = por %p457_p9, %p456_p4 }
  0x56   : > { %p454_p2 = pneg %p453_p1 }
  0x57   : > { %p460_p6 = por %p459_p8, %p458_p12 }
  0x59   : > { %p461_p13 = pnand %p460_p6, %p454_p2 }
  0x5b   : > { %464 = shalt.err (!%p461_p13)
}
  0x5c   : > { %331 = dma.vmem_to_hbm [thread:$0]  (%p755_p0), %s688_s20, 128, %s693_s14, %s192_s15  }
  0x5d PF: > { %p342_p3 = scmp.ge.s32.totalorder %s535_s13, 2  ;;  %s224_s21 = sand.u32 1, %s507_s6  }
  0x5e   : > { %p756_p5 = scmp.ne.s32.totalorder %s751_s25, 0  ;;  %s225_s30 = scalar_lea.sflag [#allocation4], %s224_s21 }
  0x60   : > { %p338_p7 = pnand %p342_p3, %p756_p5 }
  0x62   : > { %502 = dma.done.wait (!%p338_p7), %s225_s30, 128  }
  0x63   : > { %504 = vsyncadd (!%p338_p7), %s225_s30, 4294967168  ;;  %s17_s13 = sadd.s32 1, %s535_s13   ;;  %s757_s6 = smov %s511_s7 }
  0x64   : > { %p14_p10 = scmp.ge.s32.totalorder %s17_s13, 8   ;;  %s758_s7 = smov %s515_s8 }
  0x65   : > { %s759_s8 = smov %s627_s27  ;;  %s760_s9 = smov %s527_s11 }
  0x66   : > { %s761_s10 = smov %s531_s12  ;;  %s762_s11 = smov %s765_s16 }
  0x67   : > { %s763_s12 = smov %s769_s17  ;;  %16 = sbr.rel (!%p14_p10) target bundleno = 7 (0x7), region = 69 }
  0x6e   :  { %230 = vsyncpa [#allocation3], 1 }
  0x6f   :  { %232 = vsyncpa [#allocation3 + $0x1], 1 }
  0x70   :  { %233 = vsyncpa [#allocation4], 1 }
  0x71   :  { %235 = vsyncpa [#allocation4 + $0x1], 1 }

</bundles_post_ra>
